<compile_context>
chip_gen: v7x
topology: tpu7x:2x2x1
jax: 0.10.0
libtpu: 0.0.40
codegen_flags: <defaults>
</compile_context>

<pallas_src>
import jax
import jax.numpy as jnp
from jax.experimental import pallas as pl
from jax.experimental.pallas import tpu as pltpu


def _round_up(n, m):
    return ((n + m - 1) // m) * m


def dqn_kernel(x_ref, w1_ref, b1_ref, w2_ref, b2_ref, w3_ref, b3_ref, o_ref):
    # x arrives f32 straight from the caller (no wrapper pad/copy); cast to bf16 on
    # the VPU so all three matmuls run as bf16 MXU ops with f32 accumulation.
    x = x_ref[...].astype(jnp.bfloat16)
    # fc1 + relu
    h1 = jnp.dot(x, w1_ref[...], preferred_element_type=jnp.float32)
    h1 = jnp.maximum(h1 + b1_ref[...], 0.0)
    # fc2 + relu
    h2 = jnp.dot(h1.astype(jnp.bfloat16), w2_ref[...],
                 preferred_element_type=jnp.float32)
    h2 = jnp.maximum(h2 + b2_ref[...], 0.0)
    # fc3 (no activation)
    q = jnp.dot(h2.astype(jnp.bfloat16), w3_ref[...],
                preferred_element_type=jnp.float32)
    o_ref[...] = (q + b3_ref[...]).astype(o_ref.dtype)


def init_params(key, state_dim, action_dim, hidden=64):
    """Logical f32 params mimicking nn.Linear's uniform(-1/sqrt(fan_in), ...).

    Weights are stored as (in_features, out_features) == PyTorch W.T so the kernel
    computes y = x @ W + b directly on the MXU.
    """
    def linear(k, fan_in, fan_out):
        kw, kb = jax.random.split(k)
        bound = 1.0 / jnp.sqrt(jnp.float32(fan_in))
        w = jax.random.uniform(kw, (fan_in, fan_out), jnp.float32, -bound, bound)
        b = jax.random.uniform(kb, (1, fan_out), jnp.float32, -bound, bound)
        return w, b

    k1, k2, k3 = jax.random.split(key, 3)
    w1, b1 = linear(k1, state_dim, hidden)
    w2, b2 = linear(k2, hidden, hidden)
    w3, b3 = linear(k3, hidden, action_dim)
    return (w1, b1, w2, b2, w3, b3)


def pack_params(params):
    """Host-side one-time prep: weights -> bf16 MXU operands; biases stay f32.

    No lane padding: logical dims (state_dim/64/action_dim) are all <= 128 so
    full-array blocks are legal, and padding would only add HBM traffic.
    """
    w1, b1, w2, b2, w3, b3 = params
    return (w1.astype(jnp.bfloat16), b1,
            w2.astype(jnp.bfloat16), b2,
            w3.astype(jnp.bfloat16), b3)


def dqn_forward(x, packed_params, *, block_rows=1024):
    """x: (B, state_dim) f32. Returns (B, action_dim) f32 Q-values."""
    w1, b1, w2, b2, w3, b3 = packed_params
    B, S = x.shape
    H = w1.shape[1]
    A = w3.shape[1]

    # Row tiling: large tiles amortize the ~0.35 us/step pipeline overhead, but use
    # at least 2 grid steps when the batch allows it so ("parallel",) can shard the
    # batch across both v7x TensorCores (no-op on v5e/v6e).
    if B <= 8:
        tm = B  # block == full array: always a legal block shape, single step
    else:
        nb_target = max(2, pl.cdiv(B, block_rows))
        tm = min(block_rows, _round_up(pl.cdiv(B, nb_target), 8))
    grid = (pl.cdiv(B, tm),)  # ragged last block (if any) is masked by Pallas

    # Real (unpadded) cost for XLA's scheduler.
    flops = 2 * B * (S * H + H * H + H * A)
    bytes_accessed = (B * S * 4 + B * A * 4
                      + (S * H + H * H + H * A) * 2 + (2 * H + A) * 4)

    return pl.pallas_call(
        dqn_kernel,
        out_shape=jax.ShapeDtypeStruct((B, A), jnp.float32),
        grid_spec=pltpu.PrefetchScalarGridSpec(
            num_scalar_prefetch=0,
            grid=grid,
            in_specs=[
                pl.BlockSpec((tm, S), lambda i: (i, 0)),  # x : streamed f32 rows
                pl.BlockSpec((S, H), lambda i: (0, 0)),   # w1: VMEM-resident
                pl.BlockSpec((1, H), lambda i: (0, 0)),   # b1: VMEM-resident
                pl.BlockSpec((H, H), lambda i: (0, 0)),   # w2: VMEM-resident
                pl.BlockSpec((1, H), lambda i: (0, 0)),   # b2: VMEM-resident
                pl.BlockSpec((H, A), lambda i: (0, 0)),   # w3: VMEM-resident
                pl.BlockSpec((1, A), lambda i: (0, 0)),   # b3: VMEM-resident
            ],
            out_specs=pl.BlockSpec((tm, A), lambda i: (i, 0)),
        ),
        compiler_params=pltpu.CompilerParams(
            dimension_semantics=("parallel",),
        ),
        cost_estimate=pl.CostEstimate(
            flops=flops, transcendentals=0, bytes_accessed=bytes_accessed),
    )(x, w1, b1, w2, b2, w3, b3)


def dqn_reference(x, params):
    """Pure-JAX f32 reference (matches the PyTorch module's math)."""
    w1, b1, w2, b2, w3, b3 = params
    h = jnp.maximum(x @ w1 + b1, 0.0)
    h = jnp.maximum(h @ w2 + b2, 0.0)
    return h @ w3 + b3


if __name__ == "__main__":
    key = jax.random.PRNGKey(0)
    kx, kp = jax.random.split(key)

    batch, state_dim, action_dim = 8, 16, 4
    x = jax.random.normal(kx, (batch, state_dim), jnp.float32)

    params = init_params(kp, state_dim, action_dim)
    packed = pack_params(params)

    out = jax.block_until_ready(dqn_forward(x, packed))

    ref = dqn_reference(x, params)
    assert out.shape == (batch, action_dim)
    # bf16 MXU operands (f32 accumulate) -> loosen tolerance vs. pure-f32 reference.
    assert jnp.allclose(out, ref, atol=5e-2, rtol=5e-2), float(jnp.max(jnp.abs(out - ref)))

    print("KERNEL_OK")
</pallas_src>

<mosaic_0001>
module attributes {stable_mosaic.version = 11 : i64} {
  func.func @dqn_kernel(%arg0: i32, %arg1: memref<8x16xf32, #tpu.memory_space<vmem>>, %arg2: memref<16x64xbf16, #tpu.memory_space<vmem>>, %arg3: memref<1x64xf32, #tpu.memory_space<vmem>>, %arg4: memref<64x64xbf16, #tpu.memory_space<vmem>>, %arg5: memref<1x64xf32, #tpu.memory_space<vmem>>, %arg6: memref<64x4xbf16, #tpu.memory_space<vmem>>, %arg7: memref<1x4xf32, #tpu.memory_space<vmem>>, %arg8: memref<8x4xf32, #tpu.memory_space<vmem>>) attributes {dimension_semantics = [#tpu.dimension_semantics<parallel>], iteration_bounds = array<i64: 1>, scalar_prefetch = 0 : i64, scratch_operands = 0 : i64, tpu.core_type = #tpu.core_type<tc>, window_params = [{transform_indices = @transform_0, window_bounds = array<i64: 8, 16>}, {pipeline_mode = #tpu.pipeline_mode<synchronous>, transform_indices = @transform_1, window_bounds = array<i64: 16, 64>}, {pipeline_mode = #tpu.pipeline_mode<synchronous>, transform_indices = @transform_2, window_bounds = array<i64: 1, 64>}, {pipeline_mode = #tpu.pipeline_mode<synchronous>, transform_indices = @transform_3, window_bounds = array<i64: 64, 64>}, {pipeline_mode = #tpu.pipeline_mode<synchronous>, transform_indices = @transform_4, window_bounds = array<i64: 1, 64>}, {pipeline_mode = #tpu.pipeline_mode<synchronous>, transform_indices = @transform_5, window_bounds = array<i64: 64, 4>}, {pipeline_mode = #tpu.pipeline_mode<synchronous>, transform_indices = @transform_6, window_bounds = array<i64: 1, 4>}, {transform_indices = @transform_7, window_bounds = array<i64: 8, 4>}]} {
    %c0 = arith.constant 0 : index
    %c0_0 = arith.constant 0 : index
    %0 = vector.load %arg1[%c0, %c0_0] : memref<8x16xf32, #tpu.memory_space<vmem>>, vector<8x16xf32>
    %1 = arith.truncf %0 : vector<8x16xf32> to vector<8x16xbf16>
    %c0_1 = arith.constant 0 : index
    %c0_2 = arith.constant 0 : index
    %2 = vector.load %arg2[%c0_1, %c0_2] : memref<16x64xbf16, #tpu.memory_space<vmem>>, vector<16x64xbf16>
    %cst = arith.constant dense<0.000000e+00> : vector<8x64xf32>
    %3 = tpu.matmul %1, %2, %cst {dimension_numbers = #tpu.dot_dimension_numbers<[1], [0], [0], [1], [0, 0, 1, 1], [], []>} : vector<8x16xbf16>, vector<16x64xbf16>, vector<8x64xf32> -> vector<8x64xf32>
    %c0_3 = arith.constant 0 : index
    %c0_4 = arith.constant 0 : index
    %4 = vector.load %arg3[%c0_3, %c0_4] : memref<1x64xf32, #tpu.memory_space<vmem>>, vector<1x64xf32>
    %5 = vector.broadcast %4 : vector<1x64xf32> to vector<8x64xf32>
    %6 = arith.addf %3, %5 : vector<8x64xf32>
    %cst_5 = arith.constant 0.000000e+00 : f32
    %7 = vector.broadcast %cst_5 : f32 to vector<8x64xf32>
    %8 = arith.maximumf %6, %7 : vector<8x64xf32>
    %9 = arith.truncf %8 : vector<8x64xf32> to vector<8x64xbf16>
    %c0_6 = arith.constant 0 : index
    %c0_7 = arith.constant 0 : index
    %10 = vector.load %arg4[%c0_6, %c0_7] : memref<64x64xbf16, #tpu.memory_space<vmem>>, vector<64x64xbf16>
    %cst_8 = arith.constant dense<0.000000e+00> : vector<8x64xf32>
    %11 = tpu.matmul %9, %10, %cst_8 {dimension_numbers = #tpu.dot_dimension_numbers<[1], [0], [0], [1], [0, 0, 1, 1], [], []>} : vector<8x64xbf16>, vector<64x64xbf16>, vector<8x64xf32> -> vector<8x64xf32>
    %c0_9 = arith.constant 0 : index
    %c0_10 = arith.constant 0 : index
    %12 = vector.load %arg5[%c0_9, %c0_10] : memref<1x64xf32, #tpu.memory_space<vmem>>, vector<1x64xf32>
    %13 = vector.broadcast %12 : vector<1x64xf32> to vector<8x64xf32>
    %14 = arith.addf %11, %13 : vector<8x64xf32>
    %cst_11 = arith.constant 0.000000e+00 : f32
    %15 = vector.broadcast %cst_11 : f32 to vector<8x64xf32>
    %16 = arith.maximumf %14, %15 : vector<8x64xf32>
    %17 = arith.truncf %16 : vector<8x64xf32> to vector<8x64xbf16>
    %c0_12 = arith.constant 0 : index
    %c0_13 = arith.constant 0 : index
    %18 = vector.load %arg6[%c0_12, %c0_13] : memref<64x4xbf16, #tpu.memory_space<vmem>>, vector<64x4xbf16>
    %cst_14 = arith.constant dense<0.000000e+00> : vector<8x4xf32>
    %19 = tpu.matmul %17, %18, %cst_14 {dimension_numbers = #tpu.dot_dimension_numbers<[1], [0], [0], [1], [0, 0, 1, 1], [], []>} : vector<8x64xbf16>, vector<64x4xbf16>, vector<8x4xf32> -> vector<8x4xf32>
    %c0_15 = arith.constant 0 : index
    %c0_16 = arith.constant 0 : index
    %20 = vector.load %arg7[%c0_15, %c0_16] : memref<1x4xf32, #tpu.memory_space<vmem>>, vector<1x4xf32>
    %21 = vector.broadcast %20 : vector<1x4xf32> to vector<8x4xf32>
    %22 = arith.addf %19, %21 : vector<8x4xf32>
    %c0_17 = arith.constant 0 : index
    %c0_18 = arith.constant 0 : index
    %23 = vector.load %arg8[%c0_17, %c0_18] : memref<8x4xf32, #tpu.memory_space<vmem>>, vector<8x4xf32>
    tpu.vector_store %arg8[%c0_17, %c0_18], %22 {strides = array<i32>} : memref<8x4xf32, #tpu.memory_space<vmem>>, vector<8x4xf32>,
    return
  }
  func.func @transform_0(%arg0: i32) -> (i32, i32) {
    %c0_i32 = arith.constant 0 : i32
    %c0_i32_0 = arith.constant 0 : i32
    return %arg0, %c0_i32 : i32, i32
  }
  func.func @transform_1(%arg0: i32) -> (i32, i32) {
    %c0_i32 = arith.constant 0 : i32
    %c0_i32_0 = arith.constant 0 : i32
    %c0_i32_1 = arith.constant 0 : i32
    return %c0_i32, %c0_i32_0 : i32, i32
  }
  func.func @transform_2(%arg0: i32) -> (i32, i32) {
    %c0_i32 = arith.constant 0 : i32
    %c0_i32_0 = arith.constant 0 : i32
    %c0_i32_1 = arith.constant 0 : i32
    return %c0_i32, %c0_i32_0 : i32, i32
  }
  func.func @transform_3(%arg0: i32) -> (i32, i32) {
    %c0_i32 = arith.constant 0 : i32
    %c0_i32_0 = arith.constant 0 : i32
    %c0_i32_1 = arith.constant 0 : i32
    return %c0_i32, %c0_i32_0 : i32, i32
  }
  func.func @transform_4(%arg0: i32) -> (i32, i32) {
    %c0_i32 = arith.constant 0 : i32
    %c0_i32_0 = arith.constant 0 : i32
    %c0_i32_1 = arith.constant 0 : i32
    return %c0_i32, %c0_i32_0 : i32, i32
  }
  func.func @transform_5(%arg0: i32) -> (i32, i32) {
    %c0_i32 = arith.constant 0 : i32
    %c0_i32_0 = arith.constant 0 : i32
    %c0_i32_1 = arith.constant 0 : i32
    return %c0_i32, %c0_i32_0 : i32, i32
  }
  func.func @transform_6(%arg0: i32) -> (i32, i32) {
    %c0_i32 = arith.constant 0 : i32
    %c0_i32_0 = arith.constant 0 : i32
    %c0_i32_1 = arith.constant 0 : i32
    return %c0_i32, %c0_i32_0 : i32, i32
  }
  func.func @transform_7(%arg0: i32) -> (i32, i32) {
    %c0_i32 = arith.constant 0 : i32
    %c0_i32_0 = arith.constant 0 : i32
    return %arg0, %c0_i32 : i32, i32
  }
}

</mosaic_0001>

<bundles_post_ra>
// kernel: tpu_custom_call.1
= control target key start
LH: loop header
LB: loop body
LE: loop exit
PB: predicated region body
PF: predicated region fallthrough
CT: control target
= control target key end

     0   :  { %12 = vsyncpa [#allocation3], 0  ;;  %s373_s24 = smov [#allocation2]   ;;  %s471_s0 = inlined_call_operand.vmem [shape: f32[8,16], index: 0, kind: input, shape index: {}]   ;;  %s472_s1 = inlined_call_operand.hbm [shape: bf16[16,64], index: 1, kind: input, shape index: {}]   ;;  %s473_s2 = inlined_call_operand.vmem [shape: f32[1,64], index: 2, kind: input, shape index: {}]   ;;  %s474_s3 = inlined_call_operand.vmem [shape: bf16[64,64], index: 3, kind: input, shape index: {}]   ;;  %s475_s4 = inlined_call_operand.vmem [shape: f32[1,64], index: 4, kind: input, shape index: {}]   ;;  %s476_s5 = inlined_call_operand.vmem [shape: bf16[64,4], index: 5, kind: input, shape index: {}]   ;;  %s477_s6 = inlined_call_operand.vmem [shape: f32[1,4], index: 6, kind: input, shape index: {}]   ;;  %s478_s7 = inlined_call_operand.vmem [shape: f32[8,4], index: 7, kind: output, shape index: {}]  }
   0x1   :  { %s20_s25 = sshll.u32 %s373_s24, 4  ;;  %s349_s28 = scalar_lea.hbm %s472_s1, 128  ;;  %s21_s25 = int_to_ptr.vmem [resolvable:$true] %s20_s25 }
   0x2   :  { %p350_p0 = scmp.ne.s32.totalorder %s472_s1, %s349_s28  ;;  %p353_p1 = scmp.lt.u32.totalorder %s349_s28, %s472_s1 }
   0x4   :  { %p355_p2 = pnand %p353_p1, %p350_p0 }
   0x6   :  { %358 = shalt.err (!%p355_p2)
}
   0x7   :  { %s359_s10 = scalar_lea.vmem %s21_s25, 128  ;;  %p364_p4 = scmp.lt.s32.totalorder %s21_s25, %s21_s25 }
   0x8   :  { %p360_p3 = scmp.ne.s32.totalorder %s21_s25, %s359_s10  ;;  %p365_p5 = scmp.lt.s32.totalorder %s359_s10, %s359_s10 }
   0xa   :  { %p366_p6 = por %p365_p5, %p364_p4 }
   0xc   :  { %p367_p7 = pnand %p366_p6, %p360_p3 }
   0xe   :  { %370 = shalt.err (!%p367_p7)
}
   0xf   :  { %s374_s11 = smov 64   ;;  %s375_s12 = smov 4  }
  0x10   :  { %26 = dma.hbm_to_vmem [thread:$0]  %s472_s1, 128, %s21_s25, [#allocation3], %s374_s11, %s374_s11, %s375_s12  }
  0x11   :  { %371 = dma.done.wait [#allocation3], 128  }
  0x12   :  { %372 = vsyncadd [#allocation3], 4294967168  ;;  %v376_v0 = vmov 0.0   ;;  %vm377_vm0 = vmmov 0   ;;  %v340_v1 = vld [vmem:[#allocation2] sm:$0xff]   ;;  %vm58_vm1 = vcmask 130048  }
  0x13   :  { %305 = vmatprep.subr.bf16.mxu0 %v376_v0  ;;  %307 = vmatprep.mubr.msk.bf16.mxu0 %vm377_vm0, %v376_v0  ;;  %v41_v2 = vld [vmem:[%s471_s0] sm:$0xff]  ;;  %v342_v5 = vld [vmem:[%s474_s3 + $0x8] sm:$0xff]   ;;  %v343_v6 = vld [vmem:[%s474_s3 + $0x10] sm:$0xff]   ;;  %vm143_vm2 = vcmask 523264   ;;  %vm271_vm3 = vcmask 31744  }
  0x14   :  { %311 = vmatprep.subr.bf16.mxu1 %v376_v0  ;;  %319 = vmatprep.mubr.msk.bf16.mxu1 %vm377_vm0, %v376_v0  ;;  %v42_v3 = vpack.c.bf16 %v41_v2, %v41_v2  ;;  %v341_v4 = vld [vmem:[%s474_s3] sm:$0xff]   ;;  %v344_v7 = vld [vmem:[%s474_s3 + $0x18] sm:$0xff]   ;;  %v346_v9 = vld [vmem:[%s476_s5 + $0x8] sm:$0xff]  }
  0x15   :  { %306 = vmatpush3.bf16.msra.mxu0 %v340_v1  ;;  %312 = vmatpush3.bf16.msra.mxu1 %v341_v4  ;;  %v345_v8 = vld [vmem:[%s476_s5] sm:$0xff]   ;;  %v347_v18 = vld [vmem:[%s476_s5 + $0x10] sm:$0xff]   ;;  %v348_v19 = vld [vmem:[%s476_s5 + $0x18] sm:$0xff]  }
  0x16   :  { %323 = vmatprep.subr.bf16.mxu0 %v376_v0  ;;  %313 = vmatprep.subr.bf16.mxu1 %v376_v0  ;;  %v278_v10 = vld [vmem:[%s473_s2] ss:$0 sm:$0xff] }
  0x17   :  { %v281_v20 = vld [vmem:[%s475_s4] ss:$0 sm:$0xff] }
  0x18   :  { %308 = vmatmul.mubr.msk.bf16.vlgmr.msra.gmra.mrb[0].mxu0 %vm58_vm1, %v42_v3  ;;  %v287_v28 = vld [vmem:[%s477_s6] ss:$0 sm:$0xff] }
  0x19   :  { %331 = vmatprep.mubr.msk.bf16.mxu0 %vm377_vm0, %v376_v0  ;;  %314 = vmatpush3.bf16.msra.mxu1 %v342_v5 }
  0x1a   :  { %315 = vmatprep.subr.bf16.mxu1 %v376_v0  ;;  %324 = vmatpush3.bf16.msra.mxu0 %v345_v8 }
  0x1b   :  { %325 = vmatprep.subr.bf16.mxu0 %v376_v0 }
  0x1d   :  { %316 = vmatpush3.bf16.msra.mxu1 %v343_v6 }
  0x1e   :  { %317 = vmatprep.subr.bf16.mxu1 %v376_v0  ;;  %326 = vmatpush3.bf16.msra.mxu0 %v346_v9 }
  0x1f   :  { %327 = vmatprep.subr.bf16.mxu0 %v376_v0 }
  0x21   :  { %318 = vmatpush3.bf16.msra.mxu1 %v344_v7 }
  0x22   :  { %328 = vmatpush3.bf16.msra.mxu0 %v347_v18 }
  0x23   :  { %329 = vmatprep.subr.bf16.mxu0 %v376_v0 }
  0x26   :  { %330 = vmatpush3.bf16.msra.mxu0 %v348_v19 }
  0xeb   :  { %v96_v11 = vpop.f32.mrb[0].mxu0 }
  0xec   :  { %v97_v12 = vadd.f32 %v278_v10, %v96_v11  ;;  %v309_v13 = vpop.f32.mrb[1].mxu0 }
  0xed   :  { %v99_v14 = vpop.f32.mrb[2].mxu0 }
  0xee   :  { %v102_v15 = vmax.f32 %v97_v12, 0.0  ;;  %v310_v16 = vpop.f32.mrb[3].mxu0 }
  0xf0   :  { %v103_v17 = vpack.c.bf16 %v102_v15, %v102_v15 }
  0xf2   :  { %320 = vmatmul.mubr.msk.bf16.vlgmr.msra.gmra.mrb[0].mxu1 %vm143_vm2, %v103_v17 }
 0x1c5   :  { %v181_v21 = vpop.f32.mrb[0].mxu1 }
 0x1c6   :  { %v182_v22 = vadd.f32 %v281_v20, %v181_v21  ;;  %v321_v23 = vpop.f32.mrb[1].mxu1 }
 0x1c7   :  { %v184_v24 = vpop.f32.mrb[2].mxu1 }
 0x1c8   :  { %v187_v25 = vmax.f32 %v182_v22, 0.0  ;;  %v322_v26 = vpop.f32.mrb[3].mxu1 }
 0x1ca   :  { %v188_v27 = vpack.c.bf16 %v187_v25, %v187_v25 }
 0x1cc   :  { %332 = vmatmul.mubr.msk.bf16.vlgmr.msra.gmra.mrb[4].mxu0 %vm143_vm2, %v188_v27 }
 0x29f   :  { %v265_v29 = vpop.f32.mrb[4].mxu0 }
 0x2a0   :  { %v266_v30 = vadd.f32 %v287_v28, %v265_v29  ;;  %v333_v31 = vpop.f32.mrb[5].mxu0 }
 0x2a1   :  { %v268_v32 = vpop.f32.mrb[6].mxu0 }
 0x2a2   :  { %272 = vst.msk [vmem:[%s478_s7] sm:$0xff] %vm271_vm3, %v266_v30  ;;  %v334_v33 = vpop.f32.mrb[7].mxu0 }
 0x2a3   :  { %277 = vsyncpa [#allocation3], 1 }

</bundles_post_ra>
